<compile_context>
chip_gen: v7x
topology: tpu7x:2x2x1
jax: 0.10.0
libtpu: 0.0.40
codegen_flags: <defaults>
</compile_context>

<pallas_src>
import functools

import jax
import jax.numpy as jnp
from jax import lax
from jax.experimental import pallas as pl
from jax.experimental.pallas import tpu as pltpu


# --------------------------------------------------------------------------
# Kernels
# --------------------------------------------------------------------------

def _bn_stats_kernel(x_ref, colsum_ref, gram_ref, *, tm, n_half, m_total):
    """Accumulate column-sum and Gram matrix (X^T X) of x over M tiles.

    Grid is (2, n_half): axis 0 is 'parallel' (one value per TensorCore on
    v7x, sequential elsewhere), axis 1 walks this core's share of the M
    tiles.  Per-core partials land in separate output slots and are combined
    wrapper-side.  Rows beyond m_total (ragged last tile / surplus tiles of
    the second core) are masked to zero.
    """
    c = pl.program_id(0)
    i = pl.program_id(1)

    @pl.when(i == 0)
    def _():
        colsum_ref[...] = jnp.zeros_like(colsum_ref)
        gram_ref[...] = jnp.zeros_like(gram_ref)

    row0 = (c * n_half + i) * tm
    rows = row0 + lax.broadcasted_iota(jnp.int32, (x_ref.shape[0], 1), 0)
    xm = jnp.where(rows < m_total, x_ref[...].astype(jnp.float32), 0.0)

    colsum_ref[0, :, :] += jnp.sum(xm, axis=0, keepdims=True)
    # Gram = X^T X: contraction over the row (M) dimension.
    gram_ref[0, :, :] += lax.dot_general(
        xm, xm, (((0,), (0,)), ((), ())), preferred_element_type=jnp.float32)


def _mlp_main_kernel(x_ref, w1_ref, scale_ref, shift_ref, w2_ref, b2_ref,
                     o_ref, *, h_chunk):
    """Per M-tile: relu((x @ W1) * scale + shift) @ W2 + b2.

    x stays unpadded/uncast in HBM and is cast to the compute dtype here.
    The hidden dim is processed in h_chunk slices of the resident W1/W2 so
    the (tm, H) intermediate never exceeds (tm, h_chunk) f32.
    """
    cdt = w1_ref.dtype
    x = x_ref[...].astype(cdt)
    hp = w1_ref.shape[1]

    acc = None
    for c0 in range(0, hp, h_chunk):          # static loop, static ref slices
        c1 = min(c0 + h_chunk, hp)
        h = jnp.dot(x, w1_ref[:, c0:c1], preferred_element_type=jnp.float32)
        y = jnp.maximum(h * scale_ref[:, c0:c1] + shift_ref[:, c0:c1], 0.0)
        p = jnp.dot(y.astype(cdt), w2_ref[c0:c1, :],
                    preferred_element_type=jnp.float32)
        acc = p if acc is None else acc + p

    o_ref[...] = (acc + b2_ref[...]).astype(o_ref.dtype)


# --------------------------------------------------------------------------
# Wrapper helpers
# --------------------------------------------------------------------------

def _round_up(n, m):
    return ((n + m - 1) // m) * m


def _pad2d(a, rows, cols):
    pr, pc = rows - a.shape[0], cols - a.shape[1]
    if pr == 0 and pc == 0:
        return a
    return jnp.pad(a, ((0, pr), (0, pc)))


def _resident_spec(block_shape, index_map):
    """BlockSpec for a constant-index (resident) operand, single-buffered."""
    try:
        return pl.BlockSpec(block_shape, index_map, pipeline_mode=pl.Buffered(1))
    except Exception:            # Pallas version without pipeline_mode/Buffered
        return pl.BlockSpec(block_shape, index_map)


def _vmem_limit_bytes():
    """~75% of physical VMEM (v5e/v6e: 96 MiB, v7x: 48 MiB), 100 MiB cap."""
    cap = 64 * 1024 * 1024                       # conservative fallback (v7x)
    try:
        cap = int(pltpu.get_tpu_info().vmem_capacity_bytes)
    except Exception:
        pass
    return min(cap * 3 // 4, 100 * 1024 * 1024)


# --------------------------------------------------------------------------
# Forward
# --------------------------------------------------------------------------

def mlp_query_forward(x, params, *, batch_norm=True, eps=1e-5,
                      tile_m=1024, h_chunk=512, compute_dtype=jnp.bfloat16):
    """x: (B, L, 2*node_dim) -> (B, L, hidden_out).

    compute_dtype is the MXU feed dtype (weights cast wrapper-side, x cast
    in-kernel); BN statistics and all accumulation stay f32.  Pass
    compute_dtype=jnp.float32 for f32-reference-accurate results.
    """
    w1, b1, gamma, beta, w2, b2 = params
    B, L, in_dim = x.shape
    H = w1.shape[1]
    O = w2.shape[1]
    M = B * L
    out_dtype = x.dtype

    # Lane padding only for hidden / output dims (MXU-friendly, lane-dense
    # stores).  x stays unpadded in HBM.
    Hp = _round_up(H, 128)
    Op = _round_up(O, 128)
    hc = min(Hp, _round_up(h_chunk, 128))

    vmem_limit = _vmem_limit_bytes()

    # --- row tiling -------------------------------------------------------
    pack = max(8, 32 // jnp.dtype(out_dtype).itemsize)   # sublane pack (x/out)
    cbytes = jnp.dtype(compute_dtype).itemsize
    xbytes = jnp.dtype(x.dtype).itemsize
    # rough per-tile VMEM model: resident (single-buffered) weights + per-row
    # streaming/intermediate cost; caps tm so large H/O still fit v7x VMEM.
    resident = (in_dim * Hp + Hp * Op) * cbytes + (2 * Hp + Op) * 4
    row_bytes = (2 * in_dim * xbytes             # x tile (double-buffered)
                 + 2 * Op * xbytes               # out tile (double-buffered)
                 + Op * 4                        # f32 accumulator
                 + hc * (4 + cbytes))            # h (f32) + y (compute) chunk
    budget = vmem_limit * 3 // 4 - resident
    tm_cap = max(pack, (budget // max(row_bytes, 1)) // pack * pack)
    tm_want = min(tile_m, tm_cap)
    if M <= tm_want:
        tm, n_m = M, 1                           # single full-extent tile
    else:
        n_m = pl.cdiv(M, tm_want)
        if n_m > 1 and n_m % 2:
            n_m += 1                             # even tile count (v7x megacore)
        tm = _round_up(pl.cdiv(M, n_m), pack)
        n_m = pl.cdiv(M, tm)

    x2d = x.reshape(M, in_dim)                   # no pad, no cast, no HBM copy
    w1p = _pad2d(w1, in_dim, Hp).astype(compute_dtype)
    w2p = _pad2d(w2, Hp, Op).astype(compute_dtype)
    b2p = _pad2d(b2.astype(jnp.float32).reshape(1, O), 1, Op)

    if batch_norm:
        # Phase 1: colsum + Gram of x (f32); BN mean/var of h = x@W1 derived
        # wrapper-side (lin1 bias cancels under BN).
        n_half = pl.cdiv(n_m, 2)
        colsum_p, gram_p = pl.pallas_call(
            functools.partial(_bn_stats_kernel, tm=tm, n_half=n_half,
                              m_total=M),
            out_shape=(jax.ShapeDtypeStruct((2, 1, in_dim), jnp.float32),
                       jax.ShapeDtypeStruct((2, in_dim, in_dim), jnp.float32)),
            grid_spec=pltpu.PrefetchScalarGridSpec(
                num_scalar_prefetch=0,
                grid=(2, n_half),
                in_specs=[
                    pl.BlockSpec(
                        (tm, in_dim),
                        lambda c, i: (jnp.minimum(c * n_half + i, n_m - 1), 0)),
                ],
                out_specs=[
                    pl.BlockSpec((1, 1, in_dim), lambda c, i: (c, 0, 0)),
                    pl.BlockSpec((1, in_dim, in_dim), lambda c, i: (c, 0, 0)),
                ],
            ),
            compiler_params=pltpu.CompilerParams(
                dimension_semantics=("parallel", "arbitrary"),
                vmem_limit_bytes=vmem_limit),
        )(x2d)

        w1f = w1.astype(jnp.float32)
        colsum = colsum_p[0, 0] + colsum_p[1, 0]             # (in,)
        gram = gram_p[0] + gram_p[1]                         # (in, in)
        mean = (colsum / M) @ w1f                            # (H,)
        e2 = jnp.sum(((gram / M) @ w1f) * w1f, axis=0)       # (H,)
        var = jnp.maximum(e2 - mean * mean, 0.0)             # biased variance
        scale = gamma.reshape(-1).astype(jnp.float32) * lax.rsqrt(var + eps)
        shift = beta.reshape(-1).astype(jnp.float32) - mean * scale
    else:
        # No BN: identity scale, lin1 bias folded into shift. No reduction.
        scale = jnp.ones((H,), jnp.float32)
        shift = b1.reshape(-1).astype(jnp.float32)

    scale_p = _pad2d(scale.reshape(1, H), 1, Hp)
    shift_p = _pad2d(shift.reshape(1, H), 1, Hp)

    # Phase 2: fully parallel over M tiles (megacore-shardable).
    out2d = pl.pallas_call(
        functools.partial(_mlp_main_kernel, h_chunk=hc),
        out_shape=jax.ShapeDtypeStruct((M, Op), out_dtype),
        grid_spec=pltpu.PrefetchScalarGridSpec(
            num_scalar_prefetch=0,
            grid=(n_m,),
            in_specs=[
                pl.BlockSpec((tm, in_dim), lambda i: (i, 0)),     # x tile
                _resident_spec((in_dim, Hp), lambda i: (0, 0)),   # W1
                _resident_spec((1, Hp), lambda i: (0, 0)),        # scale
                _resident_spec((1, Hp), lambda i: (0, 0)),        # shift
                _resident_spec((Hp, Op), lambda i: (0, 0)),       # W2
                _resident_spec((1, Op), lambda i: (0, 0)),        # b2
            ],
            out_specs=pl.BlockSpec((tm, Op), lambda i: (i, 0)),
        ),
        compiler_params=pltpu.CompilerParams(
            dimension_semantics=("parallel",),
            vmem_limit_bytes=vmem_limit),
    )(x2d, w1p, scale_p, shift_p, w2p, b2p)

    return out2d[:, :O].reshape(B, L, O)


# --------------------------------------------------------------------------
# Reference + params
# --------------------------------------------------------------------------

def _reference_forward(x, params, *, batch_norm=True, eps=1e-5):
    """Pure-JAX reference mirroring the PyTorch forward (training-mode BN)."""
    w1, b1, gamma, beta, w2, b2 = params
    B, L, _ = x.shape
    h = x.reshape(B * L, -1) @ w1 + b1
    if batch_norm:
        mean = jnp.mean(h, axis=0, keepdims=True)
        var = jnp.mean((h - mean) ** 2, axis=0, keepdims=True)
        h = (h - mean) / jnp.sqrt(var + eps) * gamma + beta
    h = jnp.maximum(h, 0.0)
    out = h @ w2 + b2
    return out.reshape(B, L, -1)


def init_params(key, node_dim, hidden_size, hidden_out):
    """Deterministic synthetic parameters (PyTorch Linear shapes, transposed)."""
    in_dim = 2 * node_dim
    k1, k2, k3, k4 = jax.random.split(key, 4)
    # nn.Linear stores weight as (out, in); we pass (in, out) to the kernel.
    w1 = jax.random.normal(k1, (in_dim, hidden_size), jnp.float32) * 0.1
    b1 = jax.random.normal(k2, (1, hidden_size), jnp.float32) * 0.1
    gamma = jnp.ones((1, hidden_size), jnp.float32)          # bn.weight
    beta = jnp.zeros((1, hidden_size), jnp.float32)          # bn.bias
    w2 = jax.random.normal(k3, (hidden_size, hidden_out), jnp.float32) * 0.1
    b2 = jax.random.normal(k4, (1, hidden_out), jnp.float32) * 0.1
    return (w1, b1, gamma, beta, w2, b2)


if __name__ == "__main__":
    node_dim, hidden_size, hidden_out = 16, 32, 32
    B, L = 2, 8

    key = jax.random.PRNGKey(0)
    kx, kp = jax.random.split(key)
    x = jax.random.normal(kx, (B, L, 2 * node_dim), jnp.float32)
    params = init_params(kp, node_dim, hidden_size, hidden_out)

    for bn in (True, False):
        ref = _reference_forward(x, params, batch_norm=bn)

        # f32 MXU feed: tight comparison against the f32 reference.
        out32 = jax.block_until_ready(
            mlp_query_forward(x, params, batch_norm=bn,
                              compute_dtype=jnp.float32))
        assert out32.shape == (B, L, hidden_out)
        assert jnp.allclose(out32, ref, atol=1e-4, rtol=1e-4), (
            bn, float(jnp.max(jnp.abs(out32 - ref))))

        # Default bf16 MXU feed: characterized with a looser tolerance.
        outbf = jax.block_until_ready(
            mlp_query_forward(x, params, batch_norm=bn))
        assert outbf.shape == (B, L, hidden_out)
        assert jnp.allclose(outbf, ref, atol=5e-2, rtol=5e-2), (
            bn, float(jnp.max(jnp.abs(outbf - ref))))

    print("KERNEL_OK")
</pallas_src>

<mosaic_0001>
module attributes {stable_mosaic.version = 11 : i64} {
  func.func @_bn_stats_kernel(%arg0: i32, %arg1: i32, %arg2: memref<16x32xf32, #tpu.memory_space<vmem>>, %arg3: memref<1x1x32xf32, #tpu.memory_space<vmem>>, %arg4: memref<1x32x32xf32, #tpu.memory_space<vmem>>) attributes {dimension_semantics = [#tpu.dimension_semantics<parallel>, #tpu.dimension_semantics<arbitrary>], iteration_bounds = array<i64: 2, 1>, scalar_prefetch = 0 : i64, scratch_operands = 0 : i64, tpu.core_type = #tpu.core_type<tc>, window_params = [{transform_indices = @transform_0, window_bounds = array<i64: 16, 32>}, {transform_indices = @transform_1, window_bounds = array<i64: 1, 1, 32>}, {transform_indices = @transform_2, window_bounds = array<i64: 1, 32, 32>}]} {
    %c0_i32 = arith.constant 0 : i32
    %0 = arith.cmpi eq, %arg1, %c0_i32 : i32
    %1 = arith.extui %0 : i1 to i32
    %c0_i32_0 = arith.constant 0 : i32
    %2 = arith.cmpi ne, %1, %c0_i32_0 : i32
    scf.if %2 {
      %cst_17 = arith.constant 0.000000e+00 : f32
      %31 = vector.broadcast %cst_17 : f32 to vector<1x1x32xf32>
      %c0_18 = arith.constant 0 : index
      %c0_19 = arith.constant 0 : index
      %c0_20 = arith.constant 0 : index
      %32 = vector.load %arg3[%c0_18, %c0_19, %c0_20] : memref<1x1x32xf32, #tpu.memory_space<vmem>>, vector<1x1x32xf32>
      tpu.vector_store %arg3[%c0_18, %c0_19, %c0_20], %31 {strides = array<i32>} : memref<1x1x32xf32, #tpu.memory_space<vmem>>, vector<1x1x32xf32>,
      %cst_21 = arith.constant 0.000000e+00 : f32
      %33 = vector.broadcast %cst_21 : f32 to vector<1x32x32xf32>
      %c0_22 = arith.constant 0 : index
      %c0_23 = arith.constant 0 : index
      %c0_24 = arith.constant 0 : index
      %34 = vector.load %arg4[%c0_22, %c0_23, %c0_24] : memref<1x32x32xf32, #tpu.memory_space<vmem>>, vector<1x32x32xf32>
      tpu.vector_store %arg4[%c0_22, %c0_23, %c0_24], %33 {strides = array<i32>} : memref<1x32x32xf32, #tpu.memory_space<vmem>>, vector<1x32x32xf32>,
    } else {
    }
    %c1_i32 = arith.constant 1 : i32
    %3 = arith.muli %arg0, %c1_i32 : i32
    %4 = arith.addi %3, %arg1 : i32
    %c16_i32 = arith.constant 16 : i32
    %5 = arith.muli %4, %c16_i32 : i32
    %6 = tpu.iota {dimensions = array<i32: 0>} : vector<16x1xi32>
    %7 = vector.broadcast %5 : i32 to vector<16x1xi32>
    %8 = arith.addi %7, %6 : vector<16x1xi32>
    %c16_i32_1 = arith.constant 16 : i32
    %9 = vector.broadcast %c16_i32_1 : i32 to vector<16x1xi32>
    %10 = arith.cmpi slt, %8, %9 : vector<16x1xi32>
    %c0 = arith.constant 0 : index
    %c0_2 = arith.constant 0 : index
    %11 = vector.load %arg2[%c0, %c0_2] : memref<16x32xf32, #tpu.memory_space<vmem>>, vector<16x32xf32>
    %cst = arith.constant 0.000000e+00 : f32
    %12 = vector.shape_cast %10 : vector<16x1xi1> to vector<16x1xi1>
    %13 = vector.broadcast %12 : vector<16x1xi1> to vector<16x32xi1>
    %14 = vector.broadcast %cst : f32 to vector<16x32xf32>
    %15 = arith.select %13, %11, %14 : vector<16x32xi1>, vector<16x32xf32>
    %c0_3 = arith.constant 0 : index
    %c0_4 = arith.constant 0 : index
    %c0_5 = arith.constant 0 : index
    %16 = vector.load %arg3[%c0_3, %c0_4, %c0_5] : memref<1x1x32xf32, #tpu.memory_space<vmem>>, vector<1x1x32xf32>
    %17 = vector.shape_cast %16 : vector<1x1x32xf32> to vector<1x32xf32>
    %cst_6 = arith.constant dense<0.000000e+00> : vector<32xf32>
    %18 = vector.multi_reduction <add>, %15, %cst_6 [0] : vector<16x32xf32> to vector<32xf32>
    %19 = vector.shape_cast %18 : vector<32xf32> to vector<1x32xf32>
    %20 = arith.addf %17, %19 : vector<1x32xf32>
    %c0_7 = arith.constant 0 : index
    %c0_8 = arith.constant 0 : index
    %c0_9 = arith.constant 0 : index
    %21 = vector.load %arg3[%c0_7, %c0_8, %c0_9] : memref<1x1x32xf32, #tpu.memory_space<vmem>>, vector<1x1x32xf32>
    %22 = vector.shape_cast %21 : vector<1x1x32xf32> to vector<1x32xf32>
    %23 = vector.shape_cast %20 : vector<1x32xf32> to vector<1x1x32xf32>
    tpu.vector_store %arg3[%c0_7, %c0_8, %c0_9], %23 {strides = array<i32>} : memref<1x1x32xf32, #tpu.memory_space<vmem>>, vector<1x1x32xf32>,
    %c0_10 = arith.constant 0 : index
    %c0_11 = arith.constant 0 : index
    %c0_12 = arith.constant 0 : index
    %24 = vector.load %arg4[%c0_10, %c0_11, %c0_12] : memref<1x32x32xf32, #tpu.memory_space<vmem>>, vector<1x32x32xf32>
    %25 = vector.shape_cast %24 : vector<1x32x32xf32> to vector<32x32xf32>
    %cst_13 = arith.constant dense<0.000000e+00> : vector<32x32xf32>
    %26 = tpu.matmul %15, %15, %cst_13 {dimension_numbers = #tpu.dot_dimension_numbers<[0], [0], [1], [1], [0, 1, 1, 1], [], []>} : vector<16x32xf32>, vector<16x32xf32>, vector<32x32xf32> -> vector<32x32xf32>
    %27 = arith.addf %25, %26 : vector<32x32xf32>
    %c0_14 = arith.constant 0 : index
    %c0_15 = arith.constant 0 : index
    %c0_16 = arith.constant 0 : index
    %28 = vector.load %arg4[%c0_14, %c0_15, %c0_16] : memref<1x32x32xf32, #tpu.memory_space<vmem>>, vector<1x32x32xf32>
    %29 = vector.shape_cast %28 : vector<1x32x32xf32> to vector<32x32xf32>
    %30 = vector.shape_cast %27 : vector<32x32xf32> to vector<1x32x32xf32>
    tpu.vector_store %arg4[%c0_14, %c0_15, %c0_16], %30 {strides = array<i32>} : memref<1x32x32xf32, #tpu.memory_space<vmem>>, vector<1x32x32xf32>,
    return
  }
  func.func @transform_0(%arg0: i32, %arg1: i32) -> (i32, i32) {
    %c1_i32 = arith.constant 1 : i32
    %0 = arith.muli %arg0, %c1_i32 : i32
    %1 = arith.addi %0, %arg1 : i32
    %c0_i32 = arith.constant 0 : i32
    %2 = arith.minsi %1, %c0_i32 : i32
    %c0_i32_0 = arith.constant 0 : i32
    %c0_i32_1 = arith.constant 0 : i32
    return %2, %c0_i32_0 : i32, i32
  }
  func.func @transform_1(%arg0: i32, %arg1: i32) -> (i32, i32, i32) {
    %c0_i32 = arith.constant 0 : i32
    %c0_i32_0 = arith.constant 0 : i32
    %c0_i32_1 = arith.constant 0 : i32
    return %arg0, %c0_i32, %c0_i32_0 : i32, i32, i32
  }
  func.func @transform_2(%arg0: i32, %arg1: i32) -> (i32, i32, i32) {
    %c0_i32 = arith.constant 0 : i32
    %c0_i32_0 = arith.constant 0 : i32
    %c0_i32_1 = arith.constant 0 : i32
    return %arg0, %c0_i32, %c0_i32_0 : i32, i32, i32
  }
}

</mosaic_0001>

<bundles_post_ra>
// kernel: tpu_custom_call.1
= control target key start
LH: loop header
LB: loop body
LE: loop exit
PB: predicated region body
PF: predicated region fallthrough
CT: control target
= control target key end

     0   :  { %8 = vsyncpa [#allocation3], 0  ;;  %s1078_s0 = inlined_call_operand.hbm [shape: f32[16,32], index: 0, kind: input, shape index: {}]   ;;  %s1079_s1 = inlined_call_operand.hbm [shape: f32[2,1,32], index: 1, kind: output, shape index: {0}]   ;;  %s1080_s2 = inlined_call_operand.hbm [shape: f32[2,32,32], index: 2, kind: output, shape index: {1}]  }
   0x1   :  { %10 = vsyncpa [#allocation3 + $0x1], 0 }
   0x2   :  { %11 = vsyncpa [#allocation4], 0 }
   0x3   :  { %13 = vsyncpa [#allocation4 + $0x1], 0 }
   0x4   :  { %14 = vsyncpa [#allocation7], 0 }
   0x5   :  { %16 = vsyncpa [#allocation7 + $0x1], 0  ;;  %s857_s9 = smov 0   ;;  %s859_s10 = smov 0  }
   0x6   :  { %s861_s11 = smov 0   ;;  %s863_s12 = smov 0  }
   0x7   :  { %s865_s13 = smov 0   ;;  %s867_s14 = smov 0  }
   0x8   :  { %s869_s15 = smov 0   ;;  %s871_s16 = smov 0  }
   0x9 LB: > { %s522_s17 = sadd.s32 4294967295, %s832_s16   ;;  %s523_s18 = sadd.s32 4294967294, %s832_s16   ;;  %s832_s16 = sphi %s871_s16, %s22_s16   ;;  %s828_s15 = sphi %s869_s15, %s1099_s15   ;;  %s824_s14 = sphi %s867_s14, %s1098_s14   ;;  %s820_s13 = sphi %s865_s13, %s1068_s13   ;;  %s816_s12 = sphi %s863_s12, %s1097_s12   ;;  %s812_s11 = sphi %s861_s11, %s1096_s11   ;;  %s808_s10 = sphi %s859_s10, %s1095_s10   ;;  %s804_s9 = sphi %s857_s9, %s1094_s9  }
   0xa   : > { %s34_s19 = sadd.s32 1, %s828_s15  ;;  %p801_p1 = scmp.ne.s32.totalorder %s820_s13, 0 }
   0xb   : > { %p36_p0 = scmp.ge.s32.totalorder %s34_s19, 2  ;;  %p55_p2 = scmp.eq.s32.totalorder %s832_s16, 0 }
   0xc   : > { %p60_p3 = scmp.ne.s32.totalorder %s820_s13, %s816_s12  ;;  %p61_p5 = scmp.eq.s32.totalorder %s522_s17, 0 }
   0xd   : > { %s1101_s19 = smov (%p36_p0, %s34_s19), 0  ;;  %p903_p4 = por %p801_p1, %p55_p2 }
   0xe   : > { %p907_p6 = por %p61_p5, %p60_p3  ;;  %s70_s22 = ssub.s32 %s828_s15, %s1101_s19 }
   0xf   : > { %p71_p7 = scmp.eq.s32.totalorder %s70_s22, 0  ;;  %s73_s23 = sadd.s32 1, %s812_s11 }
  0x10   : > { %s1085_s21 = scalar_select %p907_p6, 1, 0 }
  0x11   : > { %s915_s24 = scalar_select %p71_p7, %s812_s11, %s73_s23  }
  0x12   : > { %p83_p8 = scmp.ne.s32.totalorder %s812_s11, %s808_s10  ;;  %p84_p9 = scmp.eq.s32.totalorder %s522_s17, 1 }
  0x13   : > { %p89_p10 = scmp.ne.s32.totalorder %s808_s10, %s804_s9  ;;  %p90_p11 = scmp.eq.s32.totalorder %s523_s18, 1 }
  0x14   : > { %p921_p12 = por %p84_p9, %p83_p8  ;;  %p588_p1 = scmp.lt.s32.totalorder %s832_s16, 2 }
  0x15   : > { %p926_p0 = por %p90_p11, %p89_p10  ;;  %s834_s27 = smov [#allocation2]  }
  0x16   : > { %s1086_s25 = scalar_select %p921_p12, 1, 0 }
  0x17   : > { %s1087_s26 = scalar_select %p926_p0, 1, 0 }
  0x18   : > { %s150_s28 = sshll.u32 %s834_s27, 4  ;;  %p933_p2 = pnand %p588_p1, %p903_p4  ;;  %s151_s28 = int_to_ptr.vmem [resolvable:$true] %s150_s28 }
  0x19   : > { %s667_s4 = scalar_lea.hbm %s1078_s0, 256 }
  0x1a   : > { %s1088_s29 = scalar_select %p933_p2, 1, 0 }
  0x1b   : > { %p668_p3 = scmp.ne.s32.totalorder %s1078_s0, %s667_s4  ;;  %p669_p5 = pneg %p933_p2 }
  0x1c   : > { %p674_p9 = scmp.lt.u32.totalorder %s667_s4, %s667_s4  ;;  %p676_p4 = scmp.lt.u32.totalorder %s667_s4, %s1078_s0 }
  0x1d   : > { %p670_p7 = pnand %p669_p5, %p668_p3 }
  0x1e   : > { %p677_p10 = por %p676_p4, %p674_p9 }
  0x1f   : > { %p671_p8 = pneg %p670_p7 }
  0x21   : > { %p678_p11 = pnand %p677_p10, %p671_p8 }
  0x23   : > { %681 = shalt.err (!%p678_p11)
}
  0x24   : > { %s682_s12 = scalar_lea.vmem %s151_s28, 256  ;;  %s689_s17 = scalar_lea.vmem %s151_s28, 512 }
  0x25   : > { %p683_p1 = scmp.ne.s32.totalorder %s151_s28, %s682_s12  ;;  %p690_p12 = scmp.lt.s32.totalorder %s151_s28, %s151_s28 }
  0x26   : > { %p691_p6 = scmp.lt.s32.totalorder %s689_s17, %s682_s12 }
  0x27   : > { %p685_p13 = pnand %p683_p1, %p669_p5 }
  0x28   : > { %p692_p2 = por %p691_p6, %p690_p12 }
  0x29   : > { %p686_p0 = pneg %p685_p13 }
  0x2b   : > { %p693_p3 = pnand %p692_p2, %p686_p0 }
  0x2d   : > { %696 = shalt.err (!%p693_p3)
}
  0x2e   : > { %s835_s18 = smov 128   ;;  %s836_s20 = smov 8  }
  0x2f   : > { %p1089_p7 = scmp.ne.s32.totalorder %s1088_s29, 0  ;;  %p529_p8 = scmp.ge.s32.totalorder %s832_s16, 1 }
  0x30   : > { %p158_p9 = scmp.lt.s32.totalorder %s832_s16, 3 }
  0x31   : > { %580 = dma.hbm_to_vmem [thread:$0]  (!%p1089_p7), %s1078_s0, 256, %s151_s28, [#allocation3], %s835_s18, %s835_s18, %s836_s20  }
  0x32   : > { %p159_p5 = pnand %p529_p8, %p158_p9 }
  0x33   : > { %s164_s27 = sand.u32 (!%p159_p5), 1, %s820_s13   ;;  %p1090_p6 = scmp.ne.s32.totalorder (!%p159_p5), %s1085_s21, 0 }
  0x34   : > { %162 = sbr.rel (%p159_p5) target bundleno = 439 (0x1b7), region = 24  ;;  %s530_s30 = sshll.u32 (!%p159_p5), %s164_s27, 4 }
  0x35   : > { %s165_s3 = scalar_lea.sflag (!%p159_p5), [#allocation3], %s164_s27  ;;  %s168_s4 = scalar_lea.vmem (!%p159_p5), [#allocation2], %s530_s30 }
  0x3b   : > { %790 = dma.done.wait (%p1090_p6), %s165_s3, 256  }
  0x3c   : > { %792 = vsyncadd (%p1090_p6), %s165_s3, 4294967040  ;;  %s532_s29 = sshll.u32 %s824_s14, 4  ;;  %v210_v0 = vlaneseq  ;;  %v218_v6 = vld [vmem:[%s168_s4] sm:$0xff]  ;;  %v219_v7 = vld [vmem:[%s168_s4 + $0x8] sm:$0xff]  ;;  %vm203_vm1 = vcmask 261120   ;;  %s966_s21 = sand.u32 1, %s808_s10  }
  0x3d   : > { %v213_v1 = vstv %s532_s29  ;;  %v563_v9 = vpack.c.bf16 %v219_v7, %v218_v6  ;;  %s531_s28 = sshll.u32 %s966_s21, 5  ;;  %v837_v14 = vmov 0.0   ;;  %vm276_vm4 = vcmask 130048   ;;  %s185_s6 = scalar_lea.vmem [#allocation5], %s966_s21 }
  0x3e   : > { %v211_v2 = vshrl.u32 %v210_v0, 7  ;;  %s969_s5 = scalar_lea.vmem [#allocation6], %s531_s28  ;;  %vm201_vm5 = vcmask 253952   ;;  %s985_s12 = scalar_lea.hbm %s1079_s1, %s532_s29 }
  0x3f   : > { %205 = vst.msk [vmem:[%s969_s5 + $0x8] sm:$0xff] %vm203_vm1, %v837_v14  ;;  %204 = vst.msk [vmem:[%s969_s5] sm:$0xff] %vm203_vm1, %v837_v14  ;;  %s400_s17 = sshll.u32 %s185_s6, 4  ;;  %s383_s18 = scalar_lea.sflag [#allocation4], %s966_s21  ;;  %s401_s17 = int_to_ptr.vmem [resolvable:$true] %s400_s17 }
  0x40   : > { %v214_v3 = vadd.s32 %v213_v1, %v211_v2  ;;  %v212_v4 = vadd.s32 8, %v211_v2  ;;  %206 = vst.msk [vmem:[%s969_s5 + $0x10] sm:$0xff] %vm203_vm1, %v837_v14  ;;  %207 = vst.msk [vmem:[%s969_s5 + $0x18] sm:$0xff] %vm203_vm1, %v837_v14  ;;  %s697_s20 = scalar_lea.vmem %s401_s17, 16  ;;  %p1091_p13 = scmp.ne.s32.totalorder %s1086_s25, 0 }
  0x41   : > { %202 = vst.msk [vmem:[%s185_s6] sm:$0x1] %vm201_vm5, %v837_v14  ;;  %p698_p12 = scmp.ne.s32.totalorder %s401_s17, %s697_s20  ;;  %s838_s22 = smov [#allocation5]  }
  0x42   : > { %vm216_vm0 = vcmp.lt.s32.totalorder %v214_v3, 16  ;;  %v215_v5 = vadd.s32 %v213_v1, %v212_v4  ;;  %s701_s23 = sshll.u32 %s838_s22, 4  ;;  %s702_s23 = int_to_ptr.vmem [resolvable:$false] %s701_s23 }
  0x43   : > { %v224_v8 = vsel %vm216_vm0, %v218_v6, 0.0  ;;  %p699_p0 = pnand %p698_p12, %p1091_p13  ;;  %s703_s27 = scalar_lea.vmem %s702_s23, 32 }
  0x44   : > { %vm217_vm2 = vcmp.lt.s32.totalorder %v215_v5, 16  ;;  %244 = vxpose.xlu0.b32.start [1/2] (short) (narrow) %v224_v8, 32  ;;  %v228_v10 = vsel %vm203_vm1, %v224_v8, 0.0  ;;  %p704_p4 = scmp.lt.s32.totalorder %s401_s17, %s702_s23  ;;  %p705_p10 = scmp.lt.s32.totalorder %s703_s27, %s697_s20 }
  0x45   : > { %v225_v11 = vsel %vm217_vm2, %v219_v7, 0.0  ;;  %vm564_vm3 = vmpackc.low %vm217_vm2, %vm216_vm0  ;;  %p700_p2 = pneg %p699_p0 }
  0x46   : > { %v229_v12 = vsel %vm203_vm1, %v225_v11, 0.0  ;;  %565 = vmatprep.subr.msk.bf16.mxu0 %vm564_vm3, %v563_v9  ;;  %569 = vmatprep.subr.msk.bf16.mxu1 %vm564_vm3, %v563_v9  ;;  %p706_p11 = por %p705_p10, %p704_p4 }
  0x47   : > { %v230_v13 = vadd.f32 %v229_v12, %v228_v10  ;;  %568 = vmatpush3.bf16.msk.msra.mxu0 %vm564_vm3, %v563_v9  ;;  %570 = vmatpush3.bf16.msk.msra.mxu1 %vm564_vm3, %v563_v9 }
  0x48   : > { %245 = vxpose.xlu0.b32.end [2/2] (short) (narrow) %v225_v11, 32  ;;  %v226_v25 = vld [vmem:[%s185_s6] sm:$0x1]  ;;  %p707_p1 = pnand %p706_p11, %p700_p2 }
  0x49   : > { %v231_v19 = vrot.slane %v230_v13, 4 }
  0x4b   : > { %v232_v20 = vadd.f32 %v231_v19, %v230_v13 }
  0x4d   : > { %v233_v21 = vrot.slane %v232_v20, 2 }
  0x4f   : > { %v234_v22 = vadd.f32 %v233_v21, %v232_v20 }
  0x51   : > { %v235_v23 = vrot.slane %v234_v22, 1 }
  0x53   : > { %v236_v24 = vadd.f32 %v235_v23, %v234_v22 }
  0x55   : > { %v237_v26 = vadd.f32 %v236_v24, %v226_v25 }
  0x57   : > { %239 = vst.msk [vmem:[%s185_s6] sm:$0x1] %vm201_vm5, %v237_v26 }
  0xc4   : > { %v260_v15 = vpop.trf.xlu0 }
  0xc5   : > { %557 = vmatprep.mubr.msk.f32.mxu0 %vm276_vm4, %v260_v15 }
  0xc8   : > { %v261_v16 = vpop.trf.xlu0 }
  0xc9   : > { %558 = vmatmul.mubr.msk.f32.vlgmr.msra.gmra.mrb[0].mxu0 %vm276_vm4, %v261_v16 }
  0xcc   : > { %v262_v17 = vpop.trf.xlu0 }
  0xcd   : > { %560 = vmatprep.mubr.msk.f32.mxu1 %vm276_vm4, %v262_v17 }
  0xd0   : > { %v263_v18 = vpop.trf.xlu0 }
  0xd1   : > { %561 = vmatmul.mubr.msk.f32.vlgmr.msra.gmra.mrb[0].mxu1 %vm276_vm4, %v263_v18 }
  0xd2   : > { %710 = shalt.err (!%p707_p1)
}
  0xd3   : > { %s711_s30 = scalar_lea.hbm %s985_s12, 16  ;;  %s715_s29 = scalar_lea.hbm %s1079_s1, 32 }
  0xd4   : > { %p712_p3 = scmp.ne.s32.totalorder %s985_s12, %s711_s30  ;;  %p716_p9 = scmp.lt.u32.totalorder %s985_s12, %s1079_s1 }
  0xd5   : > { %p717_p5 = scmp.lt.u32.totalorder %s715_s29, %s711_s30  ;;  %p719_p12 = scmp.lt.u32.totalorder %s711_s30, %s985_s12 }
  0xd6   : > { %p713_p7 = pnand %p712_p3, %p1091_p13 }
  0xd7   : > { %p718_p6 = por %p717_p5, %p716_p9 }
  0xd8   : > { %p714_p8 = pneg %p713_p7 }
  0xd9   : > { %p720_p0 = por %p719_p12, %p718_p6 }
  0xdb   : > { %p721_p2 = pnand %p720_p0, %p714_p8 }
  0xdd   : > { %724 = shalt.err (!%p721_p2)
}
  0xde   : > { %573 = dma.vmem_to_hbm [thread:$0]  (%p1091_p13), %s401_s17, 16, %s985_s12, %s383_s18   ;;  %v241_v27 = vld [vmem:[%s969_s5 + $0x8] sm:$0xff]  ;;  %v240_v28 = vld [vmem:[%s969_s5] sm:$0xff]  ;;  %v243_v33 = vld [vmem:[%s969_s5 + $0x18] sm:$0xff] }
  0xdf   : > { %s546_s7 = sshll.u32 %s824_s14, 9  ;;  %v242_v34 = vld [vmem:[%s969_s5 + $0x10] sm:$0xff]  ;;  %s413_s8 = sshll.u32 %s969_s5, 4  ;;  %s1020_s8 = int_to_ptr.vmem [resolvable:$true] %s413_s8 }
  0xe0   : > { %s1018_s18 = scalar_lea.hbm %s1080_s2, %s546_s7  ;;  %s387_s14 = scalar_lea.sflag [#allocation7], %s966_s21 }
  0xe1   : > { %s725_s20 = scalar_lea.vmem %s1020_s8, 512  ;;  %s839_s22 = smov [#allocation6]  }
  0xe2   : > { %p726_p4 = scmp.ne.s32.totalorder %s1020_s8, %s725_s20  ;;  %s729_s23 = sshll.u32 %s839_s22, 4  ;;  %s730_s23 = int_to_ptr.vmem [resolvable:$false] %s729_s23 }
  0xe3   : > { %s731_s27 = scalar_lea.vmem %s730_s23, 1024  ;;  %p732_p1 = scmp.lt.s32.totalorder %s1020_s8, %s730_s23 }
  0xe4   : > { %p727_p10 = pnand %p726_p4, %p1091_p13  ;;  %p733_p3 = scmp.lt.s32.totalorder %s731_s27, %s725_s20 }
  0xe6   : > { %p728_p11 = pneg %p727_p10  ;;  %p734_p7 = por %p733_p3, %p732_p1 }
  0xe8   : > { %p735_p8 = pnand %p734_p7, %p728_p11 }
 0x19c   : > { %v559_v29 = vpop.f32.mrb[0].mxu0 }
 0x19d   : > { %v375_v30 = vadd.f32 %v559_v29, %v241_v27  ;;  %v355_v31 = vpop.f32.mrb[1].mxu0 }
 0x19e   : > { %v374_v32 = vadd.f32 %v355_v31, %v240_v28 }
 0x19f   : > { %379 = vst.msk [vmem:[%s969_s5 + $0x8] sm:$0xff] %vm203_vm1, %v375_v30 }
 0x1a0   : > { %378 = vst.msk [vmem:[%s969_s5] sm:$0xff] %vm203_vm1, %v374_v32 }
 0x1a4   : > { %v562_v35 = vpop.f32.mrb[0].mxu1 }
 0x1a5   : > { %v377_v36 = vadd.f32 %v562_v35, %v243_v33  ;;  %v365_v37 = vpop.f32.mrb[1].mxu1 }
 0x1a6   : > { %v376_v38 = vadd.f32 %v365_v37, %v242_v34 }
 0x1a7   : > { %381 = vst.msk [vmem:[%s969_s5 + $0x18] sm:$0xff] %vm203_vm1, %v377_v36 }
 0x1a8   : > { %380 = vst.msk [vmem:[%s969_s5 + $0x10] sm:$0xff] %vm203_vm1, %v376_v38 }
 0x1a9   : > { %738 = shalt.err (!%p735_p8)
}
 0x1aa   : > { %s739_s5 = scalar_lea.hbm %s1018_s18, 512  ;;  %s743_s4 = scalar_lea.hbm %s1080_s2, 1024 }
 0x1ab   : > { %p740_p9 = scmp.ne.s32.totalorder %s1018_s18, %s739_s5  ;;  %p744_p12 = scmp.lt.u32.totalorder %s1018_s18, %s1080_s2 }
 0x1ac   : > { %p745_p0 = scmp.lt.u32.totalorder %s743_s4, %s739_s5  ;;  %p747_p4 = scmp.lt.u32.totalorder %s739_s5, %s1018_s18 }
 0x1ad   : > { %p741_p5 = pnand %p740_p9, %p1091_p13 }
 0x1ae   : > { %p746_p2 = por %p745_p0, %p744_p12 }
 0x1af   : > { %p742_p6 = pneg %p741_p5 }
 0x1b0   : > { %p748_p10 = por %p747_p4, %p746_p2 }
 0x1b2   : > { %p749_p11 = pnand %p748_p10, %p742_p6 }
 0x1b4   : > { %752 = shalt.err (!%p749_p11)
}
 0x1b5   : > { %s840_s6 = smov 128   ;;  %s841_s7 = smov 8  }
 0x1b6   : > { %574 = dma.vmem_to_hbm [thread:$0]  (%p1091_p13), %s1020_s8, 512, %s1018_s18, %s387_s14, %s840_s6, %s840_s6, %s841_s7  }
 0x1b7 PF: > { %s428_s12 = sand.u32 1, %s804_s9   ;;  %p1092_p1 = scmp.ne.s32.totalorder %s1087_s26, 0 }
 0x1b8   : > { %p1093_p3 = scmp.ge.s32.totalorder %s832_s16, 2  ;;  %s429_s17 = scalar_lea.sflag [#allocation4], %s428_s12 }
 0x1ba   : > { %p582_p7 = pnand %p1093_p3, %p1092_p1 }
 0x1bc   : > { %794 = dma.done.wait (!%p582_p7), %s429_s17, 16  }
 0x1bd   : > { %796 = vsyncadd (!%p582_p7), %s429_s17, 4294967280  ;;  %s437_s20 = scalar_lea.sflag [#allocation7], %s428_s12 }
 0x1be   : > { %798 = dma.done.wait (!%p582_p7), %s437_s20, 512  }
 0x1bf   : > { %800 = vsyncadd (!%p582_p7), %s437_s20, 4294966784  ;;  %s22_s16 = sadd.s32 1, %s832_s16   ;;  %s1094_s9 = smov %s808_s10 }
 0x1c0   : > { %p19_p8 = scmp.ge.s32.totalorder %s22_s16, 4   ;;  %s1095_s10 = smov %s812_s11 }
 0x1c1   : > { %s1096_s11 = smov %s915_s24  ;;  %s1097_s12 = smov %s820_s13 }
 0x1c2   : > { %s1068_s13 = smov 0   ;;  %s1098_s14 = smov %s828_s15 }
 0x1c3   : > { %s1099_s15 = smov %s1101_s19  ;;  %21 = sbr.rel (!%p19_p8) target bundleno = 9 (0x9), region = 90 }
 0x1ca   :  { %442 = vsyncpa [#allocation3], 1 }
 0x1cb   :  { %444 = vsyncpa [#allocation3 + $0x1], 1 }
 0x1cc   :  { %445 = vsyncpa [#allocation4], 1 }
 0x1cd   :  { %447 = vsyncpa [#allocation4 + $0x1], 1 }
 0x1ce   :  { %448 = vsyncpa [#allocation7], 1 }
 0x1cf   :  { %450 = vsyncpa [#allocation7 + $0x1], 1 }

</bundles_post_ra>
